<compile_context>
chip_gen: v7x
topology: tpu7x:2x2x1
jax: 0.10.0
libtpu: 0.0.40
codegen_flags: <defaults>
</compile_context>

<pallas_src>
import functools

import jax
import jax.numpy as jnp
from jax import lax
from jax.experimental import pallas as pl
from jax.experimental.pallas import tpu as pltpu


def _fused_mlp_kernel(x_ref, *refs, n_layers, n_sub, sub, mxu_dtype):
    """Fused MLP for one batch tile.

    x_ref : (tile, D_in) input block (batch on sublanes, as provided).
    refs  : w0, b0, w1, b1, ..., out_ref
            w_l is (d_out, d_in) (torch layout; already in the MXU dtype if one
            was requested), b_l is (d_out, 1) f32.
    out   : (1, tile) lane-dense value row (batch on lanes).

    The tile is processed in `n_sub` static sub-tiles of `sub` batch lanes so
    the live activation working set stays bounded regardless of the DMA tile.
    """
    o_ref = refs[-1]
    param_refs = refs[:-1]

    # Load params once per grid step (tiny, VMEM-resident).  No dtype casts
    # here -- any conversion happened once in the wrapper, not per grid step.
    ws = [param_refs[2 * l][...] for l in range(n_layers)]
    bs = [param_refs[2 * l + 1][...] for l in range(n_layers)]

    def compute(x):                                   # x: (sub, D_in)
        if mxu_dtype is not None:
            x = x.astype(mxu_dtype)
        h = None
        for l in range(n_layers):
            w, b = ws[l], bs[l]
            if l == 0:
                # (d_out, d_in) x (sub, d_in), contract d_in -> (d_out, sub).
                # A.B^T form: MXU-native, avoids transposing the input tile.
                z = lax.dot_general(
                    w, x, (((1,), (1,)), ((), ())),
                    preferred_element_type=jnp.float32)
            else:
                # (d_out, d_in) @ (d_in, sub) -> (d_out, sub)
                z = jnp.dot(w, h, preferred_element_type=jnp.float32)
            a = jnp.tanh(z + b)          # f32 bias add (VPU) + tanh (EUP);
            #                              activation after EVERY Linear.
            if mxu_dtype is not None and l + 1 < n_layers:
                h = a.astype(mxu_dtype)
            else:
                h = a
        return h                                      # (1, sub)

    # Static, fully-unrolled sub-tile loop (equivalent to
    # lax.fori_loop(..., unroll=True) but with static, aligned slice offsets,
    # so loads/stores lower to unmasked vld/vst with no dynamic addressing).
    for c in range(n_sub):
        lo = c * sub
        out = compute(x_ref[lo:lo + sub, :])
        o_ref[:, lo:lo + sub] = out.astype(o_ref.dtype)


def init_value_fn_params(key, layer_dims):
    """Deterministic init matching torch.nn.Linear default (uniform +-1/sqrt(fan_in)).

    Weights stored in torch layout (d_out, d_in); biases as (d_out, 1).
    """
    params = []
    for d_in, d_out in zip(layer_dims[:-1], layer_dims[1:]):
        key, kw, kb = jax.random.split(key, 3)
        bound = 1.0 / (d_in ** 0.5)
        w = jax.random.uniform(kw, (d_out, d_in), jnp.float32, -bound, bound)
        b = jax.random.uniform(kb, (d_out, 1), jnp.float32, -bound, bound)
        params.append((w, b))
    return params


def value_function_forward(state, params, *, tile_b=1024, mxu_dtype=None):
    """Pallas implementation of ValueFunction.forward: fused MLP then squeeze(-1)."""
    B, D_in = state.shape
    n_layers = len(params)
    assert params[-1][0].shape[0] == 1, "value head must end in a width-1 layer"

    SUB = 256  # inner sub-tile width: (64, 256) f32 activations ~= 16 vregs

    # --- batch tile selection (no wrapper-side padding) --------------------
    tile_cap = max(SUB, (int(tile_b) // SUB) * SUB)
    if B < 256:
        # Single block covering the whole batch (block == full array dims,
        # so no (8, 128) alignment constraint applies).
        tile = B
    else:
        # Guarantee >= 2 grid steps (v7x: two TCs share the "parallel" axis).
        # Tile is a multiple of 128 (lane-dense output stores) and of 256 when
        # that still leaves >= 2 steps (full-width inner sub-tiles).
        unit = SUB if B >= 2 * SUB else 128
        half = -(-B // 2)                     # ceil(B / 2)
        tile = min(tile_cap, ((half + unit - 1) // unit) * unit)
    grid_n = pl.cdiv(B, tile)                 # boundary block handled by Pallas
    #                                           (padded reads, masked store)

    # --- inner sub-tile width ----------------------------------------------
    if tile <= SUB:
        sub, n_sub = tile, 1
    elif tile % SUB == 0:
        sub, n_sub = SUB, tile // SUB
    else:                                     # tile is a multiple of 128 only
        sub, n_sub = 128, tile // 128

    # --- params: flatten; one-time dtype conversion happens HERE ------------
    flat_params = []
    in_specs = [pl.BlockSpec((tile, D_in), lambda i: (i, 0))]
    for (w, b) in params:
        if mxu_dtype is not None and w.dtype != mxu_dtype:
            w = w.astype(mxu_dtype)           # once per call, not per grid step
        flat_params += [w, b]
        # Constant index_map: DMA'd once, kept VMEM-resident across the grid.
        in_specs += [pl.BlockSpec(w.shape, lambda i: (0, 0)),
                     pl.BlockSpec(b.shape, lambda i: (0, 0))]

    rows = grid_n * tile                      # includes boundary-pad compute
    flops = 2 * rows * sum(int(w.size) for (w, _) in params)
    transcendentals = rows * sum(int(w.shape[0]) for (w, _) in params)
    bytes_accessed = (int(state.dtype.itemsize) * B * D_in + 4 * B
                      + sum(int(w.size) * int(w.dtype.itemsize) + 4 * int(b.size)
                            for (w, b) in params))

    kernel = functools.partial(
        _fused_mlp_kernel, n_layers=n_layers, n_sub=n_sub, sub=sub,
        mxu_dtype=mxu_dtype)

    out = pl.pallas_call(
        kernel,
        out_shape=jax.ShapeDtypeStruct((1, B), jnp.float32),
        grid=(grid_n,),
        in_specs=in_specs,
        out_specs=pl.BlockSpec((1, tile), lambda i: (0, i)),
        compiler_params=pltpu.CompilerParams(
            dimension_semantics=("parallel",)),
        cost_estimate=pl.CostEstimate(
            flops=flops,
            transcendentals=transcendentals,
            bytes_accessed=bytes_accessed),
    )(state, *flat_params)

    return out[0]                             # (B,) == squeeze(dim=-1)


def _reference_forward(state, params):
    x = state
    for (w, b) in params:
        x = jnp.tanh(x @ w.T + b[:, 0])
    return jnp.squeeze(x, axis=-1)


if __name__ == "__main__":
    layer_dims = [32, 64, 64, 1]   # obs_dim -> hidden -> hidden -> value

    k_params, k_state, k2, k3 = jax.random.split(jax.random.PRNGKey(0), 4)
    params = init_value_fn_params(k_params, layer_dims)

    # 1) Small batch: single block == full array dims, grid=(1,).  Tight f32 check.
    batch = 8
    state = jax.random.normal(k_state, (batch, layer_dims[0]), jnp.float32)
    out = jax.block_until_ready(value_function_forward(state, params))
    ref = _reference_forward(state, params)
    assert out.shape == (batch,), out.shape
    assert jnp.allclose(out, ref, atol=1e-5, rtol=1e-5)

    # 2) Ragged multi-tile batch: tile=256, grid=2, masked boundary block
    #    (no wrapper-side pad copy).
    b2 = 300
    s2 = jax.random.normal(k2, (b2, layer_dims[0]), jnp.float32)
    out2 = jax.block_until_ready(value_function_forward(s2, params))
    ref2 = _reference_forward(s2, params)
    assert out2.shape == (b2,), out2.shape
    assert jnp.allclose(out2, ref2, atol=1e-5, rtol=1e-5)

    # 3) Large-tile path: tile=1024, grid=2, 4x 256-lane inner sub-tiles,
    #    ragged boundary block.
    b3 = 2000
    s3 = jax.random.normal(k3, (b3, layer_dims[0]), jnp.float32)
    out3 = jax.block_until_ready(value_function_forward(s3, params))
    ref3 = _reference_forward(s3, params)
    assert out3.shape == (b3,), out3.shape
    assert jnp.allclose(out3, ref3, atol=1e-5, rtol=1e-5)

    # 4) Optional bf16-MXU path (params converted once in the wrapper; f32
    #    bias add / tanh / accumulation).  Not the default.
    out_bf16 = jax.block_until_ready(
        value_function_forward(state, params, mxu_dtype=jnp.bfloat16))
    assert out_bf16.shape == (batch,)
    assert jnp.allclose(out_bf16, ref, atol=3e-2, rtol=3e-2)

    print("KERNEL_OK")
</pallas_src>

<mosaic_0001>
module attributes {stable_mosaic.version = 11 : i64} {
  func.func @_fused_mlp_kernel(%arg0: i32, %arg1: memref<8x32xf32, #tpu.memory_space<vmem>>, %arg2: memref<64x32xf32, #tpu.memory_space<vmem>>, %arg3: memref<64x1xf32, #tpu.memory_space<vmem>>, %arg4: memref<64x64xf32, #tpu.memory_space<vmem>>, %arg5: memref<64x1xf32, #tpu.memory_space<vmem>>, %arg6: memref<1x64xf32, #tpu.memory_space<vmem>>, %arg7: memref<1x1xf32, #tpu.memory_space<vmem>>, %arg8: memref<1x8xf32, #tpu.memory_space<vmem>>) attributes {dimension_semantics = [#tpu.dimension_semantics<parallel>], iteration_bounds = array<i64: 1>, scalar_prefetch = 0 : i64, scratch_operands = 0 : i64, tpu.core_type = #tpu.core_type<tc>, window_params = [{transform_indices = @transform_0, window_bounds = array<i64: 8, 32>}, {pipeline_mode = #tpu.pipeline_mode<synchronous>, transform_indices = @transform_1, window_bounds = array<i64: 64, 32>}, {pipeline_mode = #tpu.pipeline_mode<synchronous>, transform_indices = @transform_2, window_bounds = array<i64: 64, 1>}, {pipeline_mode = #tpu.pipeline_mode<synchronous>, transform_indices = @transform_3, window_bounds = array<i64: 64, 64>}, {pipeline_mode = #tpu.pipeline_mode<synchronous>, transform_indices = @transform_4, window_bounds = array<i64: 64, 1>}, {pipeline_mode = #tpu.pipeline_mode<synchronous>, transform_indices = @transform_5, window_bounds = array<i64: 1, 64>}, {pipeline_mode = #tpu.pipeline_mode<synchronous>, transform_indices = @transform_6, window_bounds = array<i64: 1, 1>}, {transform_indices = @transform_7, window_bounds = array<i64: 1, 8>}]} {
    %c0 = arith.constant 0 : index
    %c0_0 = arith.constant 0 : index
    %0 = vector.load %arg2[%c0, %c0_0] : memref<64x32xf32, #tpu.memory_space<vmem>>, vector<64x32xf32>
    %c0_1 = arith.constant 0 : index
    %c0_2 = arith.constant 0 : index
    %1 = vector.load %arg4[%c0_1, %c0_2] : memref<64x64xf32, #tpu.memory_space<vmem>>, vector<64x64xf32>
    %c0_3 = arith.constant 0 : index
    %c0_4 = arith.constant 0 : index
    %2 = vector.load %arg6[%c0_3, %c0_4] : memref<1x64xf32, #tpu.memory_space<vmem>>, vector<1x64xf32>
    %c0_5 = arith.constant 0 : index
    %c0_6 = arith.constant 0 : index
    %3 = vector.load %arg3[%c0_5, %c0_6] : memref<64x1xf32, #tpu.memory_space<vmem>>, vector<64x1xf32>
    %c0_7 = arith.constant 0 : index
    %c0_8 = arith.constant 0 : index
    %4 = vector.load %arg5[%c0_7, %c0_8] : memref<64x1xf32, #tpu.memory_space<vmem>>, vector<64x1xf32>
    %c0_9 = arith.constant 0 : index
    %c0_10 = arith.constant 0 : index
    %5 = vector.load %arg7[%c0_9, %c0_10] : memref<1x1xf32, #tpu.memory_space<vmem>>, vector<1x1xf32>
    %c0_11 = arith.constant 0 : index
    %c0_12 = arith.constant 0 : index
    %6 = vector.load %arg1[%c0_11, %c0_12] : memref<8x32xf32, #tpu.memory_space<vmem>>, vector<8x32xf32>
    %cst = arith.constant dense<0.000000e+00> : vector<64x8xf32>
    %7 = tpu.matmul %0, %6, %cst {dimension_numbers = #tpu.dot_dimension_numbers<[1], [1], [0], [0], [0, 0, 1, 0], [], []>} : vector<64x32xf32>, vector<8x32xf32>, vector<64x8xf32> -> vector<64x8xf32>
    %8 = vector.broadcast %3 : vector<64x1xf32> to vector<64x8xf32>
    %9 = arith.addf %7, %8 : vector<64x8xf32>
    %10 = math.tanh %9 : vector<64x8xf32>
    %cst_13 = arith.constant dense<0.000000e+00> : vector<64x8xf32>
    %11 = tpu.matmul %1, %10, %cst_13 {dimension_numbers = #tpu.dot_dimension_numbers<[1], [0], [0], [1], [0, 0, 1, 1], [], []>} : vector<64x64xf32>, vector<64x8xf32>, vector<64x8xf32> -> vector<64x8xf32>
    %12 = vector.broadcast %4 : vector<64x1xf32> to vector<64x8xf32>
    %13 = arith.addf %11, %12 : vector<64x8xf32>
    %14 = math.tanh %13 : vector<64x8xf32>
    %cst_14 = arith.constant dense<0.000000e+00> : vector<1x8xf32>
    %15 = tpu.matmul %2, %14, %cst_14 {dimension_numbers = #tpu.dot_dimension_numbers<[1], [0], [0], [1], [0, 0, 1, 1], [], []>} : vector<1x64xf32>, vector<64x8xf32>, vector<1x8xf32> -> vector<1x8xf32>
    %16 = vector.broadcast %5 : vector<1x1xf32> to vector<1x8xf32>
    %17 = arith.addf %15, %16 : vector<1x8xf32>
    %18 = math.tanh %17 : vector<1x8xf32>
    %c0_15 = arith.constant 0 : index
    %c0_16 = arith.constant 0 : index
    %19 = vector.load %arg8[%c0_15, %c0_16] : memref<1x8xf32, #tpu.memory_space<vmem>>, vector<1x8xf32>
    tpu.vector_store %arg8[%c0_15, %c0_16], %18 {strides = array<i32>} : memref<1x8xf32, #tpu.memory_space<vmem>>, vector<1x8xf32>,
    return
  }
  func.func @transform_0(%arg0: i32) -> (i32, i32) {
    %c0_i32 = arith.constant 0 : i32
    %c0_i32_0 = arith.constant 0 : i32
    return %arg0, %c0_i32 : i32, i32
  }
  func.func @transform_1(%arg0: i32) -> (i32, i32) {
    %c0_i32 = arith.constant 0 : i32
    %c0_i32_0 = arith.constant 0 : i32
    %c0_i32_1 = arith.constant 0 : i32
    return %c0_i32, %c0_i32_0 : i32, i32
  }
  func.func @transform_2(%arg0: i32) -> (i32, i32) {
    %c0_i32 = arith.constant 0 : i32
    %c0_i32_0 = arith.constant 0 : i32
    %c0_i32_1 = arith.constant 0 : i32
    return %c0_i32, %c0_i32_0 : i32, i32
  }
  func.func @transform_3(%arg0: i32) -> (i32, i32) {
    %c0_i32 = arith.constant 0 : i32
    %c0_i32_0 = arith.constant 0 : i32
    %c0_i32_1 = arith.constant 0 : i32
    return %c0_i32, %c0_i32_0 : i32, i32
  }
  func.func @transform_4(%arg0: i32) -> (i32, i32) {
    %c0_i32 = arith.constant 0 : i32
    %c0_i32_0 = arith.constant 0 : i32
    %c0_i32_1 = arith.constant 0 : i32
    return %c0_i32, %c0_i32_0 : i32, i32
  }
  func.func @transform_5(%arg0: i32) -> (i32, i32) {
    %c0_i32 = arith.constant 0 : i32
    %c0_i32_0 = arith.constant 0 : i32
    %c0_i32_1 = arith.constant 0 : i32
    return %c0_i32, %c0_i32_0 : i32, i32
  }
  func.func @transform_6(%arg0: i32) -> (i32, i32) {
    %c0_i32 = arith.constant 0 : i32
    %c0_i32_0 = arith.constant 0 : i32
    %c0_i32_1 = arith.constant 0 : i32
    return %c0_i32, %c0_i32_0 : i32, i32
  }
  func.func @transform_7(%arg0: i32) -> (i32, i32) {
    %c0_i32 = arith.constant 0 : i32
    %c0_i32_0 = arith.constant 0 : i32
    return %c0_i32, %arg0 : i32, i32
  }
}

</mosaic_0001>

<bundles_post_ra>
// kernel: tpu_custom_call.1
= control target key start
LH: loop header
LB: loop body
LE: loop exit
PB: predicated region body
PF: predicated region fallthrough
CT: control target
= control target key end

     0   :  { %s909_s0 = inlined_call_operand.vmem [shape: f32[8,32], index: 0, kind: input, shape index: {}]   ;;  %s910_s1 = inlined_call_operand.vmem [shape: f32[64,32], index: 1, kind: input, shape index: {}]   ;;  %s911_s2 = inlined_call_operand.vmem [shape: f32[64,1], index: 2, kind: input, shape index: {}]   ;;  %s912_s3 = inlined_call_operand.vmem [shape: f32[64,64], index: 3, kind: input, shape index: {}]   ;;  %s913_s4 = inlined_call_operand.vmem [shape: f32[64,1], index: 4, kind: input, shape index: {}]   ;;  %s914_s5 = inlined_call_operand.vmem [shape: f32[1,64], index: 5, kind: input, shape index: {}]   ;;  %s915_s6 = inlined_call_operand.<no memory space> [shape: f32[1,1], index: 6, kind: input, shape index: {}]   ;;  %s916_s7 = inlined_call_operand.hbm [shape: f32[1,8], index: 7, kind: output, shape index: {}]  }
   0x1   :  { %v12_v0 = vstv %s915_s6 }
   0x2   :  { %13 = vst [vmem:[#allocation2] sm:$0x1] %v12_v0 }
   0x3   :  { %v63_v1 = vld [vmem:[%s909_s0] sm:$0xff]  ;;  %vm104_vm0 = vcmask 261120   ;;  %v30_v3 = vld [vmem:[%s910_s1 + $0x8] sm:$0xff]  ;;  %v728_v4 = vmov 0   ;;  %v31_v5 = vld [vmem:[%s910_s1 + $0x10] sm:$0xff] }
   0x4   :  { %v29_v2 = vld [vmem:[%s910_s1] sm:$0xff]  ;;  %574 = vmatprep.subr.msk.mxu0 %vm104_vm0, %v63_v1  ;;  %668 = vset.pattern.permute.xlu0 %v728_v4  ;;  %v48_v7 = vld [vmem:[%s911_s2 + $0x10] sm:$0xff]  ;;  %v47_v8 = vld [vmem:[%s911_s2 + $0x8] sm:$0xff] }
   0x5   :  { %576 = vmatprep.mubr.msk.f32.mxu0 %vm104_vm0, %v29_v2  ;;  %575 = vmatpush3.xpose.msk.msra.mxu0 %vm104_vm0, %v63_v1  ;;  %v46_v6 = vld [vmem:[%s911_s2] sm:$0xff]  ;;  %v49_v9 = vld [vmem:[%s911_s2 + $0x18] sm:$0xff] }
   0x6   :  { %669 = vset.pattern.permute.xlu1 %v728_v4  ;;  %66 = vperm.xlu0 %668, %v46_v6   ;;  %v32_v10 = vld [vmem:[%s910_s1 + $0x18] sm:$0xff]  ;;  %v33_v11 = vld [vmem:[%s910_s1 + $0x20] sm:$0xff] }
   0x7   :  { %76 = vperm.xlu1 %669, %v48_v7  }
   0x8   :  { %577 = vmatmul.mubr.msk.f32.vlgmr.msra.gmra.mrb[0].mxu0 %vm104_vm0, %v30_v3 }
   0x9   :  { %579 = vmatprep.mubr.msk.f32.mxu0 %vm104_vm0, %v31_v5 }
   0xa   :  { %71 = vperm.xlu0 %668, %v47_v8  }
   0xb   :  { %81 = vperm.xlu1 %669, %v49_v9  }
   0xc   :  { %14 = vsyncpa [#allocation4], 0  ;;  %580 = vmatmul.mubr.msk.f32.gmra.mrb[2].mxu0 %vm104_vm0, %v32_v10  ;;  %v50_v12 = vld [vmem:[%s911_s2 + $0x20] sm:$0xff]  ;;  %v51_v13 = vld [vmem:[%s911_s2 + $0x28] sm:$0xff]  ;;  %vm285_vm1 = vcmask 523264   ;;  %v729_v8 = vmov 0.0|0.0  }
   0xd   :  { %582 = vmatprep.mubr.msk.f32.mxu0 %vm104_vm0, %v33_v11  ;;  %v34_v14 = vld [vmem:[%s910_s1 + $0x28] sm:$0xff]  ;;  %v35_v15 = vld [vmem:[%s910_s1 + $0x30] sm:$0xff]  ;;  %v53_v17 = vld [vmem:[%s911_s2 + $0x38] sm:$0xff]  ;;  %651 = vmatprep.subr.bf16.mxu0 %v729_v8  ;;  %vm730_vm2 = vmmov 0   ;;  %v731_v9 = vmov 0.0   ;;  %s732_s14 = smov [#allocation3]  }
   0xe   :  { %86 = vperm.xlu0 %668, %v50_v12   ;;  %v52_v16 = vld [vmem:[%s911_s2 + $0x30] sm:$0xff]  ;;  %v36_v18 = vld [vmem:[%s910_s1 + $0x38] sm:$0xff]  ;;  %v54_v19 = vld [vmem:[%s913_s4] sm:$0xff]  ;;  %s514_s15 = sshll.u32 %s732_s14, 4  ;;  %vm506_vm3 = vcmask 57344   ;;  %s515_s15 = int_to_ptr.vmem [resolvable:$true] %s514_s15 }
   0xf   :  { %91 = vperm.xlu1 %669, %v51_v13   ;;  %v55_v20 = vld [vmem:[%s913_s4 + $0x8] sm:$0xff]  ;;  %v56_v21 = vld [vmem:[%s913_s4 + $0x10] sm:$0xff]  ;;  %v57_v22 = vld [vmem:[%s913_s4 + $0x18] sm:$0xff]  ;;  %s704_s1 = scalar_lea.vmem %s515_s15, 16  ;;  %p709_p1 = scmp.lt.s32.totalorder %s515_s15, %s515_s15 }
  0x10   :  { %583 = vmatmul.mubr.msk.f32.gmra.mrb[4].mxu0 %vm104_vm0, %v34_v14  ;;  %v58_v23 = vld [vmem:[%s913_s4 + $0x20] sm:$0xff]  ;;  %v59_v24 = vld [vmem:[%s913_s4 + $0x28] sm:$0xff]  ;;  %v60_v25 = vld [vmem:[%s913_s4 + $0x30] sm:$0xff]  ;;  %p705_p0 = scmp.ne.s32.totalorder %s515_s15, %s704_s1 }
  0x11   :  { %585 = vmatprep.mubr.msk.f32.mxu0 %vm104_vm0, %v35_v15  ;;  %v61_v26 = vld [vmem:[%s913_s4 + $0x38] sm:$0xff]  ;;  %v62_v27 = vld [vmem:[#allocation2] sm:$0x1]  ;;  %v38_v1 = vld [vmem:[%s912_s3 + $0x8] sm:$0xff] }
  0x12   :  { %96 = vperm.xlu0 %668, %v52_v16   ;;  %v37_v28 = vld [vmem:[%s912_s3] sm:$0xff]  ;;  %v39_v2 = vld [vmem:[%s912_s3 + $0x10] sm:$0xff]  ;;  %v40_v3 = vld [vmem:[%s912_s3 + $0x18] sm:$0xff] }
  0x13   :  { %101 = vperm.xlu1 %669, %v53_v17   ;;  %604 = vmatprep.mubr.msk.f32.mxu1 %vm285_vm1, %v37_v28  ;;  %v41_v4 = vld [vmem:[%s912_s3 + $0x20] sm:$0xff]  ;;  %v42_v5 = vld [vmem:[%s912_s3 + $0x28] sm:$0xff]  ;;  %v43_v6 = vld [vmem:[%s912_s3 + $0x30] sm:$0xff] }
  0x14   :  { %586 = vmatmul.mubr.msk.f32.gmra.mrb[6].mxu0 %vm104_vm0, %v36_v18  ;;  %v44_v7 = vld [vmem:[%s912_s3 + $0x38] sm:$0xff] }
  0x15   :  { %632 = vmatprep.mubr.msk.f32.mxu0 %vm730_vm2, %v731_v9 }
  0x16   :  { %247 = vperm.xlu0 %668, %v54_v19  }
  0x17   :  { %252 = vperm.xlu1 %669, %v55_v20  }
  0x1a   :  { %257 = vperm.xlu0 %668, %v56_v21  }
  0x1b   :  { %262 = vperm.xlu1 %669, %v57_v22  }
  0x1e   :  { %267 = vperm.xlu0 %668, %v58_v23  }
  0x1f   :  { %272 = vperm.xlu1 %669, %v59_v24  }
  0x22   :  { %277 = vperm.xlu0 %668, %v60_v25  }
  0x23   :  { %282 = vperm.xlu1 %669, %v61_v26  }
  0x26   :  { %425 = vperm.xlu0 %668, %v62_v27  }
  0x85   :  { %v67_v29 = vpop.permute.xlu0 %66 }
  0x86   :  { %v77_v30 = vpop.permute.xlu1 %76 }
  0x89   :  { %v72_v31 = vpop.permute.xlu0 %71 }
  0x8a   :  { %v82_v32 = vpop.permute.xlu1 %81 }
  0x8d   :  { %v87_v42 = vpop.permute.xlu0 %86 }
  0x8e   :  { %v92_v40 = vpop.permute.xlu1 %91 }
  0x91   :  { %v97_v50 = vpop.permute.xlu0 %96 }
  0x92   :  { %v102_v47 = vpop.permute.xlu1 %101 }
  0x95   :  { %v248_v11 = vpop.permute.xlu0 %247 }
  0x96   :  { %v253_v10 = vpop.permute.xlu1 %252 }
  0x99   :  { %v258_v14 = vpop.permute.xlu0 %257 }
  0x9a   :  { %v263_v12 = vpop.permute.xlu1 %262 }
  0x9d   :  { %v268_v23 = vpop.permute.xlu0 %267 }
  0x9e   :  { %v273_v21 = vpop.permute.xlu1 %272 }
  0xa2   :  { %v283_v28 = vpop.permute.xlu1 %282 }
  0xdb   :  { %v578_v33 = vpop.f32.mrb[0].mxu0 }
  0xdc   :  { %v204_v34 = vadd.f32 %v578_v33, %v72_v31  ;;  %v198_v35 = vpop.f32.mrb[1].mxu0  ;;  %v278_v31 = vpop.permute.xlu0 %277 }
  0xdd   :  { %v199_v36 = vadd.f32 %v198_v35, %v67_v29 }
  0xde   :  { %670 = vtanh.f32 %v204_v34 }
  0xdf   :  { %672 = vtanh.f32 %v199_v36  ;;  %v581_v37 = vpop.f32.mrb[2].mxu0 }
  0xe0   :  { %v214_v38 = vadd.f32 %v581_v37, %v82_v32  ;;  %v208_v39 = vpop.f32.mrb[3].mxu0 }
  0xe1   :  { %v209_v41 = vadd.f32 %v208_v39, %v77_v30 }
  0xe2   :  { %674 = vtanh.f32 %v214_v38 }
  0xe3   :  { %676 = vtanh.f32 %v209_v41  ;;  %v584_v43 = vpop.f32.mrb[4].mxu0 }
  0xe4   :  { %v224_v44 = vadd.f32 %v584_v43, %v92_v40  ;;  %v218_v45 = vpop.f32.mrb[5].mxu0 }
  0xe5   :  { %v219_v46 = vadd.f32 %v218_v45, %v87_v42 }
  0xe6   :  { %678 = vtanh.f32 %v224_v44 }
  0xe7   :  { %680 = vtanh.f32 %v219_v46  ;;  %v587_v48 = vpop.f32.mrb[6].mxu0  ;;  %v45_v46 = vld [vmem:[%s914_s5] sm:$0x1]  ;;  %s708_s5 = scalar_lea.vmem %s515_s15, 32 }
  0xe8   :  { %v671_v49 = vpop.eup %670  ;;  %v234_v51 = vadd.f32 %v587_v48, %v102_v47  ;;  %v228_v52 = vpop.f32.mrb[7].mxu0  ;;  %v428_v47 = vlaneseq  ;;  %p710_p2 = scmp.lt.s32.totalorder %s708_s5, %s704_s1 }
  0xe9   :  { %v673_v53 = vpop.eup %672  ;;  %v229_v54 = vadd.f32 %v228_v52, %v97_v50  ;;  %v426_v50 = vpop.permute.xlu0 %425 }
  0xea   :  { %682 = vtanh.f32 %v234_v51  ;;  %v635_v55 = vpack.c.bf16 %v671_v49, %v673_v53  ;;  %v429_v48 = vshrl.u32 %v428_v47, 7  ;;  %p711_p3 = por %p710_p2, %p709_p1 }
  0xeb   :  { %684 = vtanh.f32 %v229_v54 }
  0xec   :  { %v675_v56 = vpop.eup %674  ;;  %636 = vmatprep.subr.bf16.mxu1 %v635_v55  ;;  %v430_v49 = vsub.s32 0, %v429_v48  ;;  %p712_p4 = pnand %p711_p3, %p705_p0 }
  0xed   :  { %v677_v57 = vpop.eup %676  ;;  %638 = vmatpush3.bf16.msra.mxu1 %v635_v55 }
  0xee   :  { %v639_v58 = vpack.c.bf16 %v675_v56, %v677_v57  ;;  %v431_v51 = vrot.slane %v426_v50, %v430_v49 }
  0xf0   :  { %v679_v59 = vpop.eup %678  ;;  %640 = vmatprep.subr.bf16.mxu1 %v639_v58 }
  0xf1   :  { %v681_v60 = vpop.eup %680  ;;  %642 = vmatpush3.bf16.msra.mxu1 %v639_v58 }
  0xf2   :  { %v643_v61 = vpack.c.bf16 %v679_v59, %v681_v60 }
  0xf4   :  { %v683_v62 = vpop.eup %682  ;;  %644 = vmatprep.subr.bf16.mxu1 %v643_v61 }
  0xf5   :  { %v685_v63 = vpop.eup %684  ;;  %646 = vmatpush3.bf16.msra.mxu1 %v643_v61 }
  0xf6   :  { %v647_v0 = vpack.c.bf16 %v683_v62, %v685_v63 }
  0xf8   :  { %648 = vmatprep.subr.bf16.mxu1 %v647_v0 }
  0xf9   :  { %650 = vmatpush3.bf16.msra.mxu1 %v647_v0 }
  0xfc   :  { %605 = vmatmul.mubr.msk.f32.vlgmr.msra.gmra.mrb[0].mxu1 %vm285_vm1, %v38_v1 }
  0xfd   :  { %607 = vmatprep.mubr.msk.f32.mxu1 %vm285_vm1, %v39_v2 }
 0x100   :  { %608 = vmatmul.mubr.msk.f32.gmra.mrb[2].mxu1 %vm285_vm1, %v40_v3 }
 0x101   :  { %610 = vmatprep.mubr.msk.f32.mxu1 %vm285_vm1, %v41_v4 }
 0x104   :  { %611 = vmatmul.mubr.msk.f32.gmra.mrb[4].mxu1 %vm285_vm1, %v42_v5 }
 0x105   :  { %613 = vmatprep.mubr.msk.f32.mxu1 %vm285_vm1, %v43_v6 }
 0x108   :  { %614 = vmatmul.mubr.msk.f32.gmra.mrb[6].mxu1 %vm285_vm1, %v44_v7 }
 0x1cf   :  { %v606_v13 = vpop.f32.mrb[0].mxu1 }
 0x1d0   :  { %v382_v15 = vadd.f32 %v606_v13, %v253_v10  ;;  %v376_v16 = vpop.f32.mrb[1].mxu1 }
 0x1d1   :  { %v377_v17 = vadd.f32 %v376_v16, %v248_v11 }
 0x1d2   :  { %686 = vtanh.f32 %v382_v15 }
 0x1d3   :  { %688 = vtanh.f32 %v377_v17  ;;  %v609_v18 = vpop.f32.mrb[2].mxu1 }
 0x1d4   :  { %v392_v19 = vadd.f32 %v609_v18, %v263_v12  ;;  %v386_v20 = vpop.f32.mrb[3].mxu1 }
 0x1d5   :  { %v387_v22 = vadd.f32 %v386_v20, %v258_v14 }
 0x1d6   :  { %690 = vtanh.f32 %v392_v19 }
 0x1d7   :  { %692 = vtanh.f32 %v387_v22  ;;  %v612_v24 = vpop.f32.mrb[4].mxu1 }
 0x1d8   :  { %v402_v25 = vadd.f32 %v612_v24, %v273_v21  ;;  %v396_v26 = vpop.f32.mrb[5].mxu1 }
 0x1d9   :  { %v397_v27 = vadd.f32 %v396_v26, %v268_v23 }
 0x1da   :  { %694 = vtanh.f32 %v402_v25 }
 0x1db   :  { %696 = vtanh.f32 %v397_v27  ;;  %v615_v29 = vpop.f32.mrb[6].mxu1 }
 0x1dc   :  { %v687_v30 = vpop.eup %686  ;;  %v412_v32 = vadd.f32 %v615_v29, %v283_v28  ;;  %v406_v33 = vpop.f32.mrb[7].mxu1 }
 0x1dd   :  { %v689_v34 = vpop.eup %688  ;;  %v407_v35 = vadd.f32 %v406_v33, %v278_v31 }
 0x1de   :  { %698 = vtanh.f32 %v412_v32  ;;  %v652_v36 = vpack.c.bf16 %v687_v30, %v689_v34 }
 0x1df   :  { %700 = vtanh.f32 %v407_v35 }
 0x1e0   :  { %v691_v37 = vpop.eup %690  ;;  %653 = vmatpush3.bf16.msra.mxu0 %v652_v36 }
 0x1e1   :  { %v693_v38 = vpop.eup %692  ;;  %654 = vmatprep.subr.bf16.mxu0 %v729_v8 }
 0x1e2   :  { %v655_v39 = vpack.c.bf16 %v691_v37, %v693_v38 }
 0x1e4   :  { %v695_v40 = vpop.eup %694  ;;  %656 = vmatpush3.bf16.msra.mxu0 %v655_v39 }
 0x1e5   :  { %v697_v41 = vpop.eup %696  ;;  %657 = vmatprep.subr.bf16.mxu0 %v729_v8 }
 0x1e6   :  { %v658_v42 = vpack.c.bf16 %v695_v40, %v697_v41 }
 0x1e8   :  { %v699_v43 = vpop.eup %698  ;;  %659 = vmatpush3.bf16.msra.mxu0 %v658_v42 }
 0x1e9   :  { %v701_v44 = vpop.eup %700  ;;  %660 = vmatprep.subr.bf16.mxu0 %v729_v8 }
 0x1ea   :  { %v661_v45 = vpack.c.bf16 %v699_v43, %v701_v44 }
 0x1ec   :  { %662 = vmatpush3.bf16.msra.mxu0 %v661_v45 }
 0x1ef   :  { %633 = vmatmul.mubr.msk.f32.vlgmr.msra.gmra.mrb[8].mxu0 %vm285_vm1, %v45_v46 }
 0x2c2   :  { %v501_v52 = vpop.f32.mrb[8].mxu0 }
 0x2c3   :  { %v502_v53 = vadd.f32 %v501_v52, %v431_v51  ;;  %v634_v54 = vpop.f32.mrb[9].mxu0 }
 0x2c5   :  { %702 = vtanh.f32 %v502_v53 }
 0x2cf   :  { %v703_v55 = vpop.eup %702 }
 0x2d0   :  { %507 = vst.msk [vmem:[#allocation3] sm:$0x1] %vm506_vm3, %v703_v55 }
 0x2d1   :  { %715 = shalt.err (!%p712_p4)
}
 0x2d2   :  { %s716_s18 = scalar_lea.hbm %s916_s7, 16 }
 0x2d3   :  { %p717_p5 = scmp.ne.s32.totalorder %s916_s7, %s716_s18  ;;  %p720_p6 = scmp.lt.u32.totalorder %s716_s18, %s916_s7 }
 0x2d5   :  { %p722_p7 = pnand %p720_p6, %p717_p5 }
 0x2d7   :  { %725 = shalt.err (!%p722_p7)
}
 0x2d8   :  { %517 = dma.vmem_to_hbm [thread:$0]  %s515_s15, 16, %s916_s7, [#allocation4]  }
 0x2d9   :  { %726 = dma.done.wait [#allocation4], 16  }
 0x2da   :  { %727 = vsyncadd [#allocation4], 4294967280 }
 0x2db   :  { %521 = vsyncpa [#allocation4], 1 }

</bundles_post_ra>
